<compile_context>
chip_gen: v6e
topology: v6e:2x2x1
jax: 0.10.0
libtpu: 0.0.40
codegen_flags: <defaults>
</compile_context>

<pallas_src>
import functools
import math

import jax
import jax.numpy as jnp
from jax.experimental import pallas as pl
from jax.experimental.pallas import tpu as pltpu


def _round_up(x, m):
    return ((x + m - 1) // m) * m


def _embed_gather_kernel(ids_ref, lut_hbm, out_ref, row_buf, sem, *,
                         block_tokens, scale):
    """Gather `block_tokens` embedding rows and write one scaled output slab.

    ids_ref : SMEM (N_pad,) int32   -- scalar-prefetched token ids
    lut_hbm : HBM  (vocab, d_model) -- embedding table, left in place (pl.ANY)
    out_ref : VMEM (T, d_model)     -- output block for this group of tokens
    row_buf : VMEM (T, d_model)     -- gather landing buffer
    sem     : single DMA semaphore shared by the T equal-sized row copies
    """
    base = pl.program_id(0) * block_tokens

    # Issue all T row gathers; they are all in flight at once.
    @pl.loop(0, block_tokens)
    def _start(t):
        tok = ids_ref[base + t]
        pltpu.make_async_copy(lut_hbm.at[tok], row_buf.at[t], sem).start()

    # Drain the shared semaphore with T same-size descriptors; nothing is read
    # from row_buf until every row of this block has landed.
    @pl.loop(0, block_tokens)
    def _wait(t):
        pltpu.make_async_copy(lut_hbm.at[0], row_buf.at[t], sem).wait()

    # Scale rides the VPU slot (free while DMA-bound); one dense slab store.
    out_ref[...] = row_buf[...] * scale


def embeddings_forward(x, lut, *, block_tokens=256):
    """x: (B, S) int token ids; lut: (vocab, d_model).  Returns (B, S, d_model)."""
    B, S = x.shape
    vocab, d_model = lut.shape
    N = B * S
    scale = math.sqrt(d_model)

    ids = x.reshape(N).astype(jnp.int32)

    # Tokens per grid step: multiple of 8 (sublane-dense output block), capped
    # so (gather buffer + double-buffered output block) ~= 3*T*row_bytes stays
    # within an ~8 MiB budget -> safe under the default scoped VMEM limit on
    # every generation (v5e 16 MiB .. v7x 32 MiB scoped default).
    row_bytes = d_model * jnp.dtype(lut.dtype).itemsize
    vmem_budget = 8 * 1024 * 1024
    t_cap = max(8, ((vmem_budget // (3 * row_bytes)) // 8) * 8)

    T = min(_round_up(block_tokens, 8), _round_up(N, 8), t_cap)
    N_pad = _round_up(N, T)
    if N_pad != N:
        # Pad with token 0 (always a valid row); padded rows are sliced off.
        ids = jnp.concatenate([ids, jnp.zeros((N_pad - N,), jnp.int32)])
    n_blocks = N_pad // T

    # Note: all ids are scalar-prefetched into SMEM (1-D array, padded to
    # next_pow2(4*N) bytes).  Fine for typical B*S; chunked id prefetch would
    # only be needed for extremely long token streams.
    out_flat = pl.pallas_call(
        functools.partial(_embed_gather_kernel, block_tokens=T, scale=scale),
        out_shape=jax.ShapeDtypeStruct((N_pad, d_model), lut.dtype),
        grid_spec=pltpu.PrefetchScalarGridSpec(
            num_scalar_prefetch=1,           # `ids` lands in SMEM
            grid=(n_blocks,),                # one block of T tokens per step
            in_specs=[
                # Embedding table stays in HBM; rows are gathered manually.
                pl.BlockSpec(memory_space=pl.ANY),
            ],
            out_specs=pl.BlockSpec((T, d_model), lambda i, ids_ref: (i, 0)),
            scratch_shapes=[
                pltpu.VMEM((T, d_model), lut.dtype),  # gather buffer
                pltpu.SemaphoreType.DMA(()),          # shared row-copy sem
            ],
        ),
        compiler_params=pltpu.CompilerParams(
            # Each step is self-contained & writes a disjoint output block, so
            # "parallel" is safe; splits blocks across the 2 TCs on v7x.
            dimension_semantics=("parallel",),
        ),
    )(ids, lut)

    return out_flat[:N].reshape(B, S, d_model)


if __name__ == "__main__":
    # Small synthetic configuration consistent with the module.
    batch, seq = 2, 8
    d_model, vocab = 32, 64

    key = jax.random.PRNGKey(0)
    k_lut, k_ids = jax.random.split(key)

    # nn.Embedding default init ~ N(0, 1); deterministic here via PRNGKey(0).
    lut = jax.random.normal(k_lut, (vocab, d_model), dtype=jnp.float32)
    x = jax.random.randint(k_ids, (batch, seq), 0, vocab, dtype=jnp.int32)

    out = embeddings_forward(x, lut)
    out = jax.block_until_ready(out)

    # Pure-JAX reference check.
    ref = jnp.take(lut, x, axis=0) * math.sqrt(d_model)
    assert out.shape == (batch, seq, d_model)
    assert jnp.allclose(out, ref, atol=1e-6, rtol=1e-6)

    print("KERNEL_OK")
</pallas_src>

<mosaic_0001>
module attributes {stable_mosaic.version = 11 : i64} {
  func.func @_embed_gather_kernel(%arg0: i32, %arg1: memref<16xi32, #tpu.memory_space<smem>>, %arg2: memref<64x32xf32, #tpu.memory_space<any>>, %arg3: memref<16x32xf32, #tpu.memory_space<vmem>>, %arg4: memref<16x32xf32, #tpu.memory_space<vmem>>, %arg5: memref<!tpu.dma_semaphore, #tpu.memory_space<semaphore_mem>>) attributes {dimension_semantics = [#tpu.dimension_semantics<parallel>], iteration_bounds = array<i64: 1>, scalar_prefetch = 1 : i64, scratch_operands = 2 : i64, tpu.core_type = #tpu.core_type<tc>, window_params = [{}, {transform_indices = @transform_1, window_bounds = array<i64: 16, 32>}]} {
    %c16_i32 = arith.constant 16 : i32
    %0 = arith.muli %arg0, %c16_i32 : i32
    %c0_i32 = arith.constant 0 : i32
    %c16_i32_0 = arith.constant 16 : i32
    %1 = arith.addi %c0_i32, %c16_i32_0 : i32
    %c1_i32 = arith.constant 1 : i32
    scf.for %arg6 = %c0_i32 to %1 step %c1_i32  : i32 {
      %c1_i32_9 = arith.constant 1 : i32
      %7 = arith.muli %arg6, %c1_i32_9 : i32
      %c0_i32_10 = arith.constant 0 : i32
      %8 = arith.addi %c0_i32_10, %7 : i32
      %9 = arith.addi %0, %8 : i32
      %10 = arith.index_cast %9 : i32 to index
      %11 = memref.load %arg1[%10] : memref<16xi32, #tpu.memory_space<smem>>
      %c0_i32_11 = arith.constant 0 : i32
      %12 = tpu.memref_slice %arg2[%11, %c0_i32_11] : memref<64x32xf32, #tpu.memory_space<any>> -> memref<1x32xf32, #tpu.memory_space<any>>
      %13 = tpu.memref_squeeze %12 : memref<1x32xf32, #tpu.memory_space<any>> -> memref<32xf32, #tpu.memory_space<any>>
      %c0_i32_12 = arith.constant 0 : i32
      %14 = tpu.memref_slice %arg4[%8, %c0_i32_12] : memref<16x32xf32, #tpu.memory_space<vmem>> -> memref<1x32xf32, #tpu.memory_space<vmem>>
      %15 = tpu.memref_squeeze %14 : memref<1x32xf32, #tpu.memory_space<vmem>> -> memref<32xf32, #tpu.memory_space<vmem>>
      tpu.enqueue_dma source(%13 : memref<32xf32, #tpu.memory_space<any>>) target(%15 : memref<32xf32, #tpu.memory_space<vmem>>) target_semaphore(%arg5 : memref<!tpu.dma_semaphore, #tpu.memory_space<semaphore_mem>>)
    }
    %c16_i32_1 = arith.constant 16 : i32
    %c0_i32_2 = arith.constant 0 : i32
    %c16_i32_3 = arith.constant 16 : i32
    %2 = arith.addi %c0_i32_2, %c16_i32_3 : i32
    %c1_i32_4 = arith.constant 1 : i32
    scf.for %arg6 = %c0_i32_2 to %2 step %c1_i32_4  : i32 {
      %c1_i32_9 = arith.constant 1 : i32
      %7 = arith.muli %arg6, %c1_i32_9 : i32
      %c0_i32_10 = arith.constant 0 : i32
      %8 = arith.addi %c0_i32_10, %7 : i32
      %c0_i32_11 = arith.constant 0 : i32
      %c0_i32_12 = arith.constant 0 : i32
      %9 = tpu.memref_slice %arg2[%c0_i32_11, %c0_i32_12] : memref<64x32xf32, #tpu.memory_space<any>> -> memref<1x32xf32, #tpu.memory_space<any>>
      %10 = tpu.memref_squeeze %9 : memref<1x32xf32, #tpu.memory_space<any>> -> memref<32xf32, #tpu.memory_space<any>>
      %c0_i32_13 = arith.constant 0 : i32
      %11 = tpu.memref_slice %arg4[%8, %c0_i32_13] : memref<16x32xf32, #tpu.memory_space<vmem>> -> memref<1x32xf32, #tpu.memory_space<vmem>>
      %12 = tpu.memref_squeeze %11 : memref<1x32xf32, #tpu.memory_space<vmem>> -> memref<32xf32, #tpu.memory_space<vmem>>
      tpu.wait_dma2 semaphore(%arg5 : memref<!tpu.dma_semaphore, #tpu.memory_space<semaphore_mem>>) src(%10 : memref<32xf32, #tpu.memory_space<any>>) dst(%12 : memref<32xf32, #tpu.memory_space<vmem>>)
    }
    %c16_i32_5 = arith.constant 16 : i32
    %c0 = arith.constant 0 : index
    %c0_6 = arith.constant 0 : index
    %3 = vector.load %arg4[%c0, %c0_6] : memref<16x32xf32, #tpu.memory_space<vmem>>, vector<16x32xf32>
    %cst = arith.constant 5.65685415 : f32
    %4 = vector.broadcast %cst : f32 to vector<16x32xf32>
    %5 = arith.mulf %3, %4 : vector<16x32xf32>
    %c0_7 = arith.constant 0 : index
    %c0_8 = arith.constant 0 : index
    %6 = vector.load %arg3[%c0_7, %c0_8] : memref<16x32xf32, #tpu.memory_space<vmem>>, vector<16x32xf32>
    tpu.vector_store %arg3[%c0_7, %c0_8], %5 {strides = array<i32>} : memref<16x32xf32, #tpu.memory_space<vmem>>, vector<16x32xf32>,
    return
  }
  func.func @transform_1(%arg0: i32, %arg1: memref<16xi32, #tpu.memory_space<smem>>) -> (i32, i32) {
    %c0_i32 = arith.constant 0 : i32
    %c0_i32_0 = arith.constant 0 : i32
    return %arg0, %c0_i32 : i32, i32
  }
}

</mosaic_0001>

<bundles_post_ra>
// kernel: tpu_custom_call.1
= control target key start
LH: loop header
LB: loop body
LE: loop exit
PB: predicated region body
PF: predicated region fallthrough
CT: control target
= control target key end

     0   :  { %s233_s0 = inlined_call_operand.vmem [shape: s32[16], index: 0, kind: input, shape index: {}]   ;;  %s234_s1 = inlined_call_operand.vmem [shape: f32[64,32], index: 1, kind: input, shape index: {}]   ;;  %s235_s2 = inlined_call_operand.hbm [shape: f32[16,32], index: 2, kind: output, shape index: {}]  }
   0x1   :  { %s7_s11 = sshll.u32 %s233_s0, 4  ;;  %s8_s11 = int_to_ptr.vmem [resolvable:$true] %s7_s11 }
   0x2   :  { %s151_s12 = scalar_lea.vmem %s8_s11, 16  ;;  %p156_p1 = scmp.lt.s32.totalorder %s8_s11, %s8_s11 }
   0x3   :  { %p152_p0 = scmp.ne.s32.totalorder %s8_s11, %s151_s12  ;;  %p157_p2 = scmp.lt.s32.totalorder %s151_s12, %s151_s12 }
   0x5   :  { %p158_p3 = por %p157_p2, %p156_p1 }
   0x7   :  { %p159_p4 = pnand %p158_p3, %p152_p0 }
   0x9   :  { %162 = shalt.err (!%p159_p4)  }
   0xa   :  { %s205_s13 = smov [#allocation5]  }
   0xb   :  { %10 = dma.vmem_to_smem %s8_s11, 16, %s205_s13, [#allocation4] }
   0xc   :  { %191 = dma.done.wait [#allocation4], 16 }
   0xd   :  { %192 = vsyncadd [#allocation4], 4294967280 }
   0xe   :  { %12 = sfence }
   0xf   :  { %13 = vsyncpa [#allocation7], 0  ;;  %s197_s14 = smov 0  }
  0x10 LB: > { %s22_s15 = sld [smem:[#allocation5 + %s199_s14]]  ;;  %s24_s18 = scalar_lea.vmem [#allocation2], %s199_s14  ;;  %s199_s14 = sphi %s197_s14, %s20_s14  }
  0x16   : > { %s23_s17 = scalar_lea.vmem %s234_s1, %s22_s15 }
  0x17   : > { %v43_v0 = vld [vmem:[%s23_s17] sm:$0x1] }
  0x18   : > { %44 = vst [vmem:[%s24_s18] sm:$0x1] %v43_v0 }
  0x19   : > { %70 = vsyncadd [#allocation3], 16  ;;  %s20_s14 = sadd.s32 1, %s199_s14  }
  0x1a   : > { %p17_p5 = scmp.ge.s32.totalorder %s20_s14, 16  }
  0x1b   :  { %s201_s19 = smov (%p17_p5), 0  }
  0x1c   :  { %19 = sbr.rel (!%p17_p5) target bundleno = 16 (0x10), region = 76 }
  0x21 LB: > { %193 = dma.done.wait [#allocation3], 16  ;;  %s203_s19 = sphi %s201_s19, %s76_s19  }
  0x22   : > { %194 = vsyncadd [#allocation3], 4294967280  ;;  %s76_s19 = sadd.s32 1, %s203_s19  }
  0x23   : > { %p73_p6 = scmp.ge.s32.totalorder %s76_s19, 16  }
  0x24   :  { %v79_v1 = vld [vmem:[#allocation2] sm:$0xff] (%p73_p6)  ;;  %vm83_vm0 = vcmask (%p73_p6), 261120   ;;  %v80_v2 = vld [vmem:[#allocation2 + $0x8] sm:$0xff] (%p73_p6)  ;;  %s206_s20 = smov (%p73_p6), [#allocation6]  }
  0x25   :  { %75 = sbr.rel (!%p73_p6) target bundleno = 33 (0x21), region = 87  ;;  %v81_v3 = vmul.f32 (%p73_p6), 5.656854, %v79_v1  ;;  %v82_v4 = vmul.f32 (%p73_p6), 5.656854, %v80_v2  ;;  %s91_s21 = sshll.u32 (%p73_p6), %s206_s20, 4  ;;  %s92_s21 = int_to_ptr.vmem [resolvable:$true] %s91_s21 }
  0x26   :  { %s163_s1 = scalar_lea.vmem (%p73_p6), %s92_s21, 256  ;;  %p168_p8 = scmp.lt.s32.totalorder (%p73_p6), %s92_s21, %s92_s21 }
  0x27   :  { %84 = vst.msk [vmem:[#allocation6] sm:$0xff] (%p73_p6), %vm83_vm0, %v81_v3  ;;  %85 = vst.msk [vmem:[#allocation6 + $0x8] sm:$0xff] (%p73_p6), %vm83_vm0, %v82_v4  ;;  %p164_p7 = scmp.ne.s32.totalorder (%p73_p6), %s92_s21, %s163_s1  ;;  %p169_p9 = scmp.lt.s32.totalorder (%p73_p6), %s163_s1, %s163_s1 }
  0x29   :  { %p170_p10 = por (%p73_p6), %p169_p9, %p168_p8 }
  0x2b   :  { %p171_p11 = pnand %p170_p10, %p164_p7 }
  0x2d   :  { %174 = shalt.err (!%p171_p11)
}
  0x2e   :  { %s207_s22 = smov 128   ;;  %s208_s23 = smov 8  }
  0x2f   :  { %97 = dma.vmem_to_hbm [thread:$0]  %s92_s21, 256, %s235_s2, [#allocation7], %s207_s22, %s207_s22, %s208_s23  }
  0x30   :  { %195 = dma.done.wait [#allocation7], 256  }
  0x31   :  { %196 = vsyncadd [#allocation7], 4294967040 }
  0x32   :  { %101 = vsyncpa [#allocation7], 1 }
  0x33   :  { %102 = vsyncmov [#allocation3] }
  0x36   :  { %s103_s26 = vpop.sfrf %102 }
  0x37   :  { %p130_p12 = scmp.ne.s32.totalorder %s103_s26, 0 }
  0x39   :  { %107 = shalt.err (%p130_p12)  }

</bundles_post_ra>
